<compile_context>
chip_gen: v7x
topology: tpu7x:2x2x1
jax: 0.10.0
libtpu: 0.0.40
codegen_flags: <defaults>
</compile_context>

<pallas_src>
import math

import jax
import jax.numpy as jnp
import numpy as np
from jax.experimental import pallas as pl
from jax.experimental.pallas import tpu as pltpu  # noqa: F401  (TPU backend)

# ---------------- small config (consistent with GemmaConfig) ----------------
B, S = 2, 8
HIDDEN = 32
INTER = 64
NUM_HEADS = 4
NUM_KV_HEADS = 2
HEAD_DIM = 16
N_REP = NUM_HEADS // NUM_KV_HEADS
EPS = 1e-6
ROPE_THETA = 10000.0

Q_WIDTH = NUM_HEADS * HEAD_DIM        # 64
KV_WIDTH = NUM_KV_HEADS * HEAD_DIM    # 32
QKV_WIDTH = Q_WIDTH + 2 * KV_WIDTH    # 128  (lane-dense fused projection)
GU_WIDTH = 2 * INTER                  # 128  (lane-dense fused gate/up)
T = B * S                             # 16 rows processed in one shot
NEG_INF = -1e9                        # cross-batch / causal mask fill


# ----------------------------- fused kernel ----------------------------------
def decoder_layer_kernel(x_ref, mask_ref, cosf_ref, sinf_ref,
                         ln1_ref, ln2_ref,
                         wqkv_ref, wo_ref, wgu_ref, wd_ref,
                         o_ref):
    x = x_ref[...].astype(jnp.float32)            # (T, H)  rows = flattened (b, s)
    mask = mask_ref[...].astype(jnp.float32)      # (T, T)  block-diag causal mask

    # ---- input RMSNorm (Gemma: scale by (1 + w); (1+w) precomputed) ----
    ms = jnp.mean(x * x, axis=-1, keepdims=True)
    xn = x * jax.lax.rsqrt(ms + EPS) * ln1_ref[...]

    # ---- fused QKV + rotate_half projection: (T, H) @ (H, 256) -> (T, 256) ----
    # columns [:128]  = [q(scaled by 1/sqrt(D)) | k | v]
    # columns [128:]  = same thing pre-multiplied by the rotate_half matrix
    both = jnp.dot(xn, wqkv_ref[...], preferred_element_type=jnp.float32)
    qkv = both[:, :QKV_WIDTH] * cosf_ref[...] + both[:, QKV_WIDTH:] * sinf_ref[...]
    # (cos_full = 1 and sin_full = 0 on the v columns, so v passes through.)

    # ---- attention over all heads, both batch elements at once ----
    # GQA via h // N_REP indexing; batch separation via the block-diagonal mask.
    k_heads = [
        qkv[:, Q_WIDTH + g * HEAD_DIM: Q_WIDTH + (g + 1) * HEAD_DIM]
        for g in range(NUM_KV_HEADS)
    ]
    v_heads = [
        qkv[:, Q_WIDTH + KV_WIDTH + g * HEAD_DIM: Q_WIDTH + KV_WIDTH + (g + 1) * HEAD_DIM]
        for g in range(NUM_KV_HEADS)
    ]

    out_heads = []
    for h in range(NUM_HEADS):
        qh = qkv[:, h * HEAD_DIM:(h + 1) * HEAD_DIM]          # (T, D), scale folded in
        kh = k_heads[h // N_REP]
        vh = v_heads[h // N_REP]
        # q @ k^T without materializing a transpose (contract last dims).
        s = jax.lax.dot_general(qh, kh, (((1,), (1,)), ((), ())),
                                preferred_element_type=jnp.float32) + mask
        s = s - jnp.max(s, axis=-1, keepdims=True)
        p = jnp.exp(s)                                         # cross-batch -> exactly 0
        p = p / jnp.sum(p, axis=-1, keepdims=True)             # exact divide (f32)
        out_heads.append(jnp.dot(p, vh, preferred_element_type=jnp.float32))
    attn = jnp.concatenate(out_heads, axis=-1)                 # (T, NH*D)

    attn_o = jnp.dot(attn, wo_ref[...], preferred_element_type=jnp.float32)  # (T, H)
    h1 = x + attn_o                                            # residual add 1

    # ---- post-attention RMSNorm + fused gate/up + tanh-GELU + down ----
    ms2 = jnp.mean(h1 * h1, axis=-1, keepdims=True)
    xn2 = h1 * jax.lax.rsqrt(ms2 + EPS) * ln2_ref[...]
    gu = jnp.dot(xn2, wgu_ref[...], preferred_element_type=jnp.float32)      # (T, 128)
    g = gu[:, :INTER]
    u = gu[:, INTER:]
    c = math.sqrt(2.0 / math.pi)
    gelu = 0.5 * g * (1.0 + jnp.tanh(c * (g + 0.044715 * g * g * g)))
    mlp_o = jnp.dot(gelu * u, wd_ref[...], preferred_element_type=jnp.float32)

    o_ref[...] = (h1 + mlp_o).astype(o_ref.dtype)              # residual add 2


# -------------------- one-time weight preparation (outside jit) ---------------
def _rotate_half_matrix():
    """Signed permutation R with x @ R == rotate_half(x), block-diag per head."""
    half = HEAD_DIM // 2
    R = np.zeros((QKV_WIDTH, QKV_WIDTH), np.float32)
    for head in range(NUM_HEADS + NUM_KV_HEADS):   # q heads then k heads; v stays 0
        base = head * HEAD_DIM
        for j in range(half):
            R[base + half + j, base + j] = -1.0    # out[j]       = -x[j + half]
            R[base + j, base + half + j] = 1.0     # out[j+half]  =  x[j]
    return jnp.asarray(R)


def prepare_params(raw):
    """Pre-transpose / concatenate nn.Linear weights once; fold scales."""
    inv_sqrt_d = 1.0 / math.sqrt(HEAD_DIM)
    wq = raw["q_w"].T * inv_sqrt_d                 # (H, 64)  attention scale folded in
    wk = raw["k_w"].T                              # (H, 32)
    wv = raw["v_w"].T                              # (H, 32)
    wqkv = jnp.concatenate([wq, wk, wv], axis=1)   # (H, 128)
    wqkv_rot = wqkv @ _rotate_half_matrix()        # (H, 128) rotate_half folded (exact)
    return {
        "ln1": (1.0 + raw["input_ln_w"]).reshape(1, HIDDEN),
        "ln2": (1.0 + raw["post_ln_w"]).reshape(1, HIDDEN),
        "wqkv_full": jnp.concatenate([wqkv, wqkv_rot], axis=1),   # (H, 256)
        "wo_t": raw["o_w"].T,                                     # (NH*D, H)
        "wgu_t": jnp.concatenate(
            [raw["gate_w"].T, raw["up_w"].T], axis=1),            # (H, 128)
        "wd_t": raw["down_w"].T,                                  # (I, H)
    }


def rope_tables(position_ids, dtype):
    inv_freq = 1.0 / (
        ROPE_THETA ** (jnp.arange(0, HEAD_DIM, 2, dtype=jnp.float32) / HEAD_DIM)
    )
    freqs = position_ids.astype(jnp.float32)[:, :, None] * inv_freq[None, None, :]
    emb = jnp.concatenate([freqs, freqs], axis=-1)  # (B, S, D)
    return jnp.cos(emb).astype(dtype), jnp.sin(emb).astype(dtype)


# --------------------------- full decoder layer -------------------------------
@jax.jit
def gemma_decoder_layer(prepared, hidden_states, attention_mask, position_ids):
    Bb, Ss, H = hidden_states.shape
    Tt = Bb * Ss
    x2d = hidden_states.reshape(Tt, H)

    # RoPE tables flattened to (T, D), then broadcast across q/k head columns.
    cos, sin = rope_tables(position_ids, jnp.float32)
    cos = cos.reshape(Tt, HEAD_DIM)
    sin = sin.reshape(Tt, HEAD_DIM)
    cos_full = jnp.concatenate(
        [jnp.tile(cos, (1, NUM_HEADS)), jnp.tile(cos, (1, NUM_KV_HEADS)),
         jnp.ones((Tt, KV_WIDTH), jnp.float32)], axis=-1)          # (T, 128)
    sin_full = jnp.concatenate(
        [jnp.tile(sin, (1, NUM_HEADS)), jnp.tile(sin, (1, NUM_KV_HEADS)),
         jnp.zeros((Tt, KV_WIDTH), jnp.float32)], axis=-1)         # (T, 128)

    # Block-diagonal (T, T) mask: per-batch causal mask on the diagonal blocks,
    # -1e9 off-block so attention never crosses batch elements.
    m = attention_mask[:, 0].astype(jnp.float32)                   # (B, S, S)
    full_mask = jnp.full((Tt, Tt), NEG_INF, jnp.float32)
    for b in range(Bb):
        full_mask = jax.lax.dynamic_update_slice(full_mask, m[b], (b * Ss, b * Ss))

    out2d = pl.pallas_call(
        decoder_layer_kernel,
        out_shape=jax.ShapeDtypeStruct((Tt, H), hidden_states.dtype),
        # No grid: single invocation, all operands resident in VMEM as full arrays.
    )(x2d, full_mask, cos_full, sin_full,
      prepared["ln1"], prepared["ln2"], prepared["wqkv_full"],
      prepared["wo_t"], prepared["wgu_t"], prepared["wd_t"])
    return out2d.reshape(Bb, Ss, H)


# ------------------------------ reference (JAX) --------------------------------
def reference(params, hidden_states, attention_mask, position_ids):
    def rms(x, w):
        ms = jnp.mean(x * x, axis=-1, keepdims=True)
        return x * jax.lax.rsqrt(ms + EPS) * (1.0 + w)

    def rotate_half(x):
        h = x.shape[-1] // 2
        return jnp.concatenate([-x[..., h:], x[..., :h]], axis=-1)

    cos, sin = rope_tables(position_ids, hidden_states.dtype)
    cos_b = cos[:, None, :, :]
    sin_b = sin[:, None, :, :]

    residual = hidden_states
    x = rms(hidden_states, params["input_ln_w"])
    q = jnp.einsum("bsh,oh->bso", x, params["q_w"]).reshape(B, S, NUM_HEADS, HEAD_DIM)
    k = jnp.einsum("bsh,oh->bso", x, params["k_w"]).reshape(B, S, NUM_KV_HEADS, HEAD_DIM)
    v = jnp.einsum("bsh,oh->bso", x, params["v_w"]).reshape(B, S, NUM_KV_HEADS, HEAD_DIM)
    q = q.transpose(0, 2, 1, 3)
    k = k.transpose(0, 2, 1, 3)
    v = v.transpose(0, 2, 1, 3)
    q = q * cos_b + rotate_half(q) * sin_b
    k = k * cos_b + rotate_half(k) * sin_b
    k = jnp.repeat(k, N_REP, axis=1)
    v = jnp.repeat(v, N_REP, axis=1)
    scores = jnp.einsum("bhqd,bhkd->bhqk", q, k) / math.sqrt(HEAD_DIM)
    scores = scores + attention_mask
    probs = jax.nn.softmax(scores.astype(jnp.float32), axis=-1)
    attn = jnp.einsum("bhqk,bhkd->bhqd", probs, v)
    attn = attn.transpose(0, 2, 1, 3).reshape(B, S, NUM_HEADS * HEAD_DIM)
    attn = jnp.einsum("bso,ho->bsh", attn, params["o_w"])
    hidden = residual + attn

    residual = hidden
    x = rms(hidden, params["post_ln_w"])
    g = jnp.einsum("bsh,ih->bsi", x, params["gate_w"])
    u = jnp.einsum("bsh,ih->bsi", x, params["up_w"])
    c = math.sqrt(2.0 / math.pi)
    gelu = 0.5 * g * (1.0 + jnp.tanh(c * (g + 0.044715 * g**3)))
    down = jnp.einsum("bsi,hi->bsh", gelu * u, params["down_w"])
    return residual + down


# ----------------------------------- main --------------------------------------
if __name__ == "__main__":
    key = jax.random.PRNGKey(0)
    keys = jax.random.split(key, 12)

    def w(k, shape, scale=0.05):
        return scale * jax.random.normal(k, shape, jnp.float32)

    params = {
        "input_ln_w": w(keys[1], (HIDDEN,), 0.1),
        "post_ln_w": w(keys[2], (HIDDEN,), 0.1),
        "q_w": w(keys[3], (NUM_HEADS * HEAD_DIM, HIDDEN)),
        "k_w": w(keys[4], (NUM_KV_HEADS * HEAD_DIM, HIDDEN)),
        "v_w": w(keys[5], (NUM_KV_HEADS * HEAD_DIM, HIDDEN)),
        "o_w": w(keys[6], (HIDDEN, NUM_HEADS * HEAD_DIM)),
        "gate_w": w(keys[7], (INTER, HIDDEN)),
        "up_w": w(keys[8], (INTER, HIDDEN)),
        "down_w": w(keys[9], (HIDDEN, INTER)),
    }

    hidden_states = jax.random.normal(keys[0], (B, S, HIDDEN), jnp.float32)
    position_ids = jnp.tile(jnp.arange(S, dtype=jnp.int32)[None, :], (B, 1))
    causal = jnp.tril(jnp.ones((S, S), jnp.float32))
    attention_mask = jnp.tile(
        jnp.where(causal == 1.0, 0.0, NEG_INF)[None, None, :, :], (B, 1, 1, 1)
    )

    # Weight preparation happens exactly once, outside the jitted forward.
    # TODO(synk): KVCache update / attention dropout are inference-irrelevant here
    # (kv_cache=None, dropout p=0) and are not implemented in the kernel.
    prepared = jax.tree_util.tree_map(jax.block_until_ready, prepare_params(params))

    out = gemma_decoder_layer(prepared, hidden_states, attention_mask, position_ids)
    out = jax.block_until_ready(out)

    ref = reference(params, hidden_states, attention_mask, position_ids)
    np.testing.assert_allclose(np.asarray(out), np.asarray(ref), rtol=2e-4, atol=2e-4)

    print("KERNEL_OK")
</pallas_src>

<mosaic_0001>
module attributes {stable_mosaic.version = 11 : i64} {
  func.func @decoder_layer_kernel(%arg0: memref<16x32xf32, #tpu.memory_space<vmem>>, %arg1: memref<16x16xf32, #tpu.memory_space<vmem>>, %arg2: memref<16x128xf32, #tpu.memory_space<vmem>>, %arg3: memref<16x128xf32, #tpu.memory_space<vmem>>, %arg4: memref<1x32xf32, #tpu.memory_space<vmem>>, %arg5: memref<1x32xf32, #tpu.memory_space<vmem>>, %arg6: memref<32x256xf32, #tpu.memory_space<vmem>>, %arg7: memref<64x32xf32, #tpu.memory_space<vmem>>, %arg8: memref<32x128xf32, #tpu.memory_space<vmem>>, %arg9: memref<64x32xf32, #tpu.memory_space<vmem>>, %arg10: memref<16x32xf32, #tpu.memory_space<vmem>>) attributes {dimension_semantics = [], scalar_prefetch = 0 : i64, scratch_operands = 0 : i64, tpu.core_type = #tpu.core_type<tc>} {
    %c0 = arith.constant 0 : index
    %c0_0 = arith.constant 0 : index
    %0 = vector.load %arg0[%c0, %c0_0] : memref<16x32xf32, #tpu.memory_space<vmem>>, vector<16x32xf32>
    %c0_1 = arith.constant 0 : index
    %c0_2 = arith.constant 0 : index
    %1 = vector.load %arg1[%c0_1, %c0_2] : memref<16x16xf32, #tpu.memory_space<vmem>>, vector<16x16xf32>
    %2 = arith.mulf %0, %0 : vector<16x32xf32>
    %cst = arith.constant dense<0.000000e+00> : vector<16xf32>
    %3 = vector.multi_reduction <add>, %2, %cst [1] : vector<16x32xf32> to vector<16xf32>
    %4 = vector.shape_cast %3 : vector<16xf32> to vector<16x1xf32>
    %cst_3 = arith.constant 3.200000e+01 : f32
    %5 = vector.broadcast %cst_3 : f32 to vector<16x1xf32>
    %6 = arith.divf %4, %5 : vector<16x1xf32>
    %cst_4 = arith.constant 9.99999997E-7 : f32
    %7 = vector.broadcast %cst_4 : f32 to vector<16x1xf32>
    %8 = arith.addf %6, %7 : vector<16x1xf32>
    %9 = math.rsqrt %8 : vector<16x1xf32>
    %10 = vector.broadcast %9 : vector<16x1xf32> to vector<16x32xf32>
    %11 = arith.mulf %0, %10 : vector<16x32xf32>
    %c0_5 = arith.constant 0 : index
    %c0_6 = arith.constant 0 : index
    %12 = vector.load %arg4[%c0_5, %c0_6] : memref<1x32xf32, #tpu.memory_space<vmem>>, vector<1x32xf32>
    %13 = vector.broadcast %12 : vector<1x32xf32> to vector<16x32xf32>
    %14 = arith.mulf %11, %13 : vector<16x32xf32>
    %c0_7 = arith.constant 0 : index
    %c0_8 = arith.constant 0 : index
    %15 = vector.load %arg6[%c0_7, %c0_8] : memref<32x256xf32, #tpu.memory_space<vmem>>, vector<32x256xf32>
    %cst_9 = arith.constant dense<0.000000e+00> : vector<16x256xf32>
    %16 = tpu.matmul %14, %15, %cst_9 {dimension_numbers = #tpu.dot_dimension_numbers<[1], [0], [0], [1], [0, 0, 1, 1], [], []>} : vector<16x32xf32>, vector<32x256xf32>, vector<16x256xf32> -> vector<16x256xf32>
    %17 = vector.extract_strided_slice %16 {offsets = [0, 0], sizes = [16, 128], strides = [1, 1]} : vector<16x256xf32> to vector<16x128xf32>
    %c0_10 = arith.constant 0 : index
    %c0_11 = arith.constant 0 : index
    %18 = vector.load %arg2[%c0_10, %c0_11] : memref<16x128xf32, #tpu.memory_space<vmem>>, vector<16x128xf32>
    %19 = arith.mulf %17, %18 : vector<16x128xf32>
    %20 = vector.extract_strided_slice %16 {offsets = [0, 128], sizes = [16, 128], strides = [1, 1]} : vector<16x256xf32> to vector<16x128xf32>
    %c0_12 = arith.constant 0 : index
    %c0_13 = arith.constant 0 : index
    %21 = vector.load %arg3[%c0_12, %c0_13] : memref<16x128xf32, #tpu.memory_space<vmem>>, vector<16x128xf32>
    %22 = arith.mulf %20, %21 : vector<16x128xf32>
    %23 = arith.addf %19, %22 : vector<16x128xf32>
    %24 = vector.extract_strided_slice %23 {offsets = [0, 64], sizes = [16, 16], strides = [1, 1]} : vector<16x128xf32> to vector<16x16xf32>
    %25 = vector.extract_strided_slice %23 {offsets = [0, 80], sizes = [16, 16], strides = [1, 1]} : vector<16x128xf32> to vector<16x16xf32>
    %26 = vector.extract_strided_slice %23 {offsets = [0, 96], sizes = [16, 16], strides = [1, 1]} : vector<16x128xf32> to vector<16x16xf32>
    %27 = vector.extract_strided_slice %23 {offsets = [0, 112], sizes = [16, 16], strides = [1, 1]} : vector<16x128xf32> to vector<16x16xf32>
    %28 = vector.extract_strided_slice %23 {offsets = [0, 0], sizes = [16, 16], strides = [1, 1]} : vector<16x128xf32> to vector<16x16xf32>
    %cst_14 = arith.constant dense<0.000000e+00> : vector<16x16xf32>
    %29 = tpu.matmul %28, %24, %cst_14 {dimension_numbers = #tpu.dot_dimension_numbers<[1], [1], [0], [0], [0, 0, 1, 0], [], []>} : vector<16x16xf32>, vector<16x16xf32>, vector<16x16xf32> -> vector<16x16xf32>
    %30 = arith.addf %29, %1 : vector<16x16xf32>
    %cst_15 = arith.constant dense<0xFF800000> : vector<16xf32>
    %31 = vector.multi_reduction <maximumf>, %30, %cst_15 [1] : vector<16x16xf32> to vector<16xf32>
    %32 = vector.shape_cast %31 : vector<16xf32> to vector<16x1xf32>
    %33 = vector.broadcast %32 : vector<16x1xf32> to vector<16x16xf32>
    %34 = arith.subf %30, %33 : vector<16x16xf32>
    %35 = math.exp %34 : vector<16x16xf32>
    %cst_16 = arith.constant dense<0.000000e+00> : vector<16xf32>
    %36 = vector.multi_reduction <add>, %35, %cst_16 [1] : vector<16x16xf32> to vector<16xf32>
    %37 = vector.shape_cast %36 : vector<16xf32> to vector<16x1xf32>
    %38 = vector.broadcast %37 : vector<16x1xf32> to vector<16x16xf32>
    %39 = arith.divf %35, %38 : vector<16x16xf32>
    %cst_17 = arith.constant dense<0.000000e+00> : vector<16x16xf32>
    %40 = tpu.matmul %39, %26, %cst_17 {dimension_numbers = #tpu.dot_dimension_numbers<[1], [0], [0], [1], [0, 0, 1, 1], [], []>} : vector<16x16xf32>, vector<16x16xf32>, vector<16x16xf32> -> vector<16x16xf32>
    %41 = vector.extract_strided_slice %23 {offsets = [0, 16], sizes = [16, 16], strides = [1, 1]} : vector<16x128xf32> to vector<16x16xf32>
    %cst_18 = arith.constant dense<0.000000e+00> : vector<16x16xf32>
    %42 = tpu.matmul %41, %24, %cst_18 {dimension_numbers = #tpu.dot_dimension_numbers<[1], [1], [0], [0], [0, 0, 1, 0], [], []>} : vector<16x16xf32>, vector<16x16xf32>, vector<16x16xf32> -> vector<16x16xf32>
    %43 = arith.addf %42, %1 : vector<16x16xf32>
    %cst_19 = arith.constant dense<0xFF800000> : vector<16xf32>
    %44 = vector.multi_reduction <maximumf>, %43, %cst_19 [1] : vector<16x16xf32> to vector<16xf32>
    %45 = vector.shape_cast %44 : vector<16xf32> to vector<16x1xf32>
    %46 = vector.broadcast %45 : vector<16x1xf32> to vector<16x16xf32>
    %47 = arith.subf %43, %46 : vector<16x16xf32>
    %48 = math.exp %47 : vector<16x16xf32>
    %cst_20 = arith.constant dense<0.000000e+00> : vector<16xf32>
    %49 = vector.multi_reduction <add>, %48, %cst_20 [1] : vector<16x16xf32> to vector<16xf32>
    %50 = vector.shape_cast %49 : vector<16xf32> to vector<16x1xf32>
    %51 = vector.broadcast %50 : vector<16x1xf32> to vector<16x16xf32>
    %52 = arith.divf %48, %51 : vector<16x16xf32>
    %cst_21 = arith.constant dense<0.000000e+00> : vector<16x16xf32>
    %53 = tpu.matmul %52, %26, %cst_21 {dimension_numbers = #tpu.dot_dimension_numbers<[1], [0], [0], [1], [0, 0, 1, 1], [], []>} : vector<16x16xf32>, vector<16x16xf32>, vector<16x16xf32> -> vector<16x16xf32>
    %54 = vector.extract_strided_slice %23 {offsets = [0, 32], sizes = [16, 16], strides = [1, 1]} : vector<16x128xf32> to vector<16x16xf32>
    %cst_22 = arith.constant dense<0.000000e+00> : vector<16x16xf32>
    %55 = tpu.matmul %54, %25, %cst_22 {dimension_numbers = #tpu.dot_dimension_numbers<[1], [1], [0], [0], [0, 0, 1, 0], [], []>} : vector<16x16xf32>, vector<16x16xf32>, vector<16x16xf32> -> vector<16x16xf32>
    %56 = arith.addf %55, %1 : vector<16x16xf32>
    %cst_23 = arith.constant dense<0xFF800000> : vector<16xf32>
    %57 = vector.multi_reduction <maximumf>, %56, %cst_23 [1] : vector<16x16xf32> to vector<16xf32>
    %58 = vector.shape_cast %57 : vector<16xf32> to vector<16x1xf32>
    %59 = vector.broadcast %58 : vector<16x1xf32> to vector<16x16xf32>
    %60 = arith.subf %56, %59 : vector<16x16xf32>
    %61 = math.exp %60 : vector<16x16xf32>
    %cst_24 = arith.constant dense<0.000000e+00> : vector<16xf32>
    %62 = vector.multi_reduction <add>, %61, %cst_24 [1] : vector<16x16xf32> to vector<16xf32>
    %63 = vector.shape_cast %62 : vector<16xf32> to vector<16x1xf32>
    %64 = vector.broadcast %63 : vector<16x1xf32> to vector<16x16xf32>
    %65 = arith.divf %61, %64 : vector<16x16xf32>
    %cst_25 = arith.constant dense<0.000000e+00> : vector<16x16xf32>
    %66 = tpu.matmul %65, %27, %cst_25 {dimension_numbers = #tpu.dot_dimension_numbers<[1], [0], [0], [1], [0, 0, 1, 1], [], []>} : vector<16x16xf32>, vector<16x16xf32>, vector<16x16xf32> -> vector<16x16xf32>
    %67 = vector.extract_strided_slice %23 {offsets = [0, 48], sizes = [16, 16], strides = [1, 1]} : vector<16x128xf32> to vector<16x16xf32>
    %cst_26 = arith.constant dense<0.000000e+00> : vector<16x16xf32>
    %68 = tpu.matmul %67, %25, %cst_26 {dimension_numbers = #tpu.dot_dimension_numbers<[1], [1], [0], [0], [0, 0, 1, 0], [], []>} : vector<16x16xf32>, vector<16x16xf32>, vector<16x16xf32> -> vector<16x16xf32>
    %69 = arith.addf %68, %1 : vector<16x16xf32>
    %cst_27 = arith.constant dense<0xFF800000> : vector<16xf32>
    %70 = vector.multi_reduction <maximumf>, %69, %cst_27 [1] : vector<16x16xf32> to vector<16xf32>
    %71 = vector.shape_cast %70 : vector<16xf32> to vector<16x1xf32>
    %72 = vector.broadcast %71 : vector<16x1xf32> to vector<16x16xf32>
    %73 = arith.subf %69, %72 : vector<16x16xf32>
    %74 = math.exp %73 : vector<16x16xf32>
    %cst_28 = arith.constant dense<0.000000e+00> : vector<16xf32>
    %75 = vector.multi_reduction <add>, %74, %cst_28 [1] : vector<16x16xf32> to vector<16xf32>
    %76 = vector.shape_cast %75 : vector<16xf32> to vector<16x1xf32>
    %77 = vector.broadcast %76 : vector<16x1xf32> to vector<16x16xf32>
    %78 = arith.divf %74, %77 : vector<16x16xf32>
    %cst_29 = arith.constant dense<0.000000e+00> : vector<16x16xf32>
    %79 = tpu.matmul %78, %27, %cst_29 {dimension_numbers = #tpu.dot_dimension_numbers<[1], [0], [0], [1], [0, 0, 1, 1], [], []>} : vector<16x16xf32>, vector<16x16xf32>, vector<16x16xf32> -> vector<16x16xf32>
    %80 = tpu.concatenate %40, %53, %66, %79 in 1 : vector<16x16xf32>, vector<16x16xf32>, vector<16x16xf32>, vector<16x16xf32> -> vector<16x64xf32>
    %c0_30 = arith.constant 0 : index
    %c0_31 = arith.constant 0 : index
    %81 = vector.load %arg7[%c0_30, %c0_31] : memref<64x32xf32, #tpu.memory_space<vmem>>, vector<64x32xf32>
    %cst_32 = arith.constant dense<0.000000e+00> : vector<16x32xf32>
    %82 = tpu.matmul %80, %81, %cst_32 {dimension_numbers = #tpu.dot_dimension_numbers<[1], [0], [0], [1], [0, 0, 1, 1], [], []>} : vector<16x64xf32>, vector<64x32xf32>, vector<16x32xf32> -> vector<16x32xf32>
    %83 = arith.addf %0, %82 : vector<16x32xf32>
    %84 = arith.mulf %83, %83 : vector<16x32xf32>
    %cst_33 = arith.constant dense<0.000000e+00> : vector<16xf32>
    %85 = vector.multi_reduction <add>, %84, %cst_33 [1] : vector<16x32xf32> to vector<16xf32>
    %86 = vector.shape_cast %85 : vector<16xf32> to vector<16x1xf32>
    %cst_34 = arith.constant 3.200000e+01 : f32
    %87 = vector.broadcast %cst_34 : f32 to vector<16x1xf32>
    %88 = arith.divf %86, %87 : vector<16x1xf32>
    %cst_35 = arith.constant 9.99999997E-7 : f32
    %89 = vector.broadcast %cst_35 : f32 to vector<16x1xf32>
    %90 = arith.addf %88, %89 : vector<16x1xf32>
    %91 = math.rsqrt %90 : vector<16x1xf32>
    %92 = vector.broadcast %91 : vector<16x1xf32> to vector<16x32xf32>
    %93 = arith.mulf %83, %92 : vector<16x32xf32>
    %c0_36 = arith.constant 0 : index
    %c0_37 = arith.constant 0 : index
    %94 = vector.load %arg5[%c0_36, %c0_37] : memref<1x32xf32, #tpu.memory_space<vmem>>, vector<1x32xf32>
    %95 = vector.broadcast %94 : vector<1x32xf32> to vector<16x32xf32>
    %96 = arith.mulf %93, %95 : vector<16x32xf32>
    %c0_38 = arith.constant 0 : index
    %c0_39 = arith.constant 0 : index
    %97 = vector.load %arg8[%c0_38, %c0_39] : memref<32x128xf32, #tpu.memory_space<vmem>>, vector<32x128xf32>
    %cst_40 = arith.constant dense<0.000000e+00> : vector<16x128xf32>
    %98 = tpu.matmul %96, %97, %cst_40 {dimension_numbers = #tpu.dot_dimension_numbers<[1], [0], [0], [1], [0, 0, 1, 1], [], []>} : vector<16x32xf32>, vector<32x128xf32>, vector<16x128xf32> -> vector<16x128xf32>
    %99 = vector.extract_strided_slice %98 {offsets = [0, 0], sizes = [16, 64], strides = [1, 1]} : vector<16x128xf32> to vector<16x64xf32>
    %100 = vector.extract_strided_slice %98 {offsets = [0, 64], sizes = [16, 64], strides = [1, 1]} : vector<16x128xf32> to vector<16x64xf32>
    %cst_41 = arith.constant 5.000000e-01 : f32
    %101 = vector.broadcast %cst_41 : f32 to vector<16x64xf32>
    %102 = arith.mulf %101, %99 : vector<16x64xf32>
    %cst_42 = arith.constant 4.471500e-02 : f32
    %103 = vector.broadcast %cst_42 : f32 to vector<16x64xf32>
    %104 = arith.mulf %103, %99 : vector<16x64xf32>
    %105 = arith.mulf %104, %99 : vector<16x64xf32>
    %106 = arith.mulf %105, %99 : vector<16x64xf32>
    %107 = arith.addf %99, %106 : vector<16x64xf32>
    %cst_43 = arith.constant 0.797884583 : f32
    %108 = vector.broadcast %cst_43 : f32 to vector<16x64xf32>
    %109 = arith.mulf %108, %107 : vector<16x64xf32>
    %110 = math.tanh %109 : vector<16x64xf32>
    %cst_44 = arith.constant 1.000000e+00 : f32
    %111 = vector.broadcast %cst_44 : f32 to vector<16x64xf32>
    %112 = arith.addf %111, %110 : vector<16x64xf32>
    %113 = arith.mulf %102, %112 : vector<16x64xf32>
    %114 = arith.mulf %113, %100 : vector<16x64xf32>
    %c0_45 = arith.constant 0 : index
    %c0_46 = arith.constant 0 : index
    %115 = vector.load %arg9[%c0_45, %c0_46] : memref<64x32xf32, #tpu.memory_space<vmem>>, vector<64x32xf32>
    %cst_47 = arith.constant dense<0.000000e+00> : vector<16x32xf32>
    %116 = tpu.matmul %114, %115, %cst_47 {dimension_numbers = #tpu.dot_dimension_numbers<[1], [0], [0], [1], [0, 0, 1, 1], [], []>} : vector<16x64xf32>, vector<64x32xf32>, vector<16x32xf32> -> vector<16x32xf32>
    %117 = arith.addf %83, %116 : vector<16x32xf32>
    %c0_48 = arith.constant 0 : index
    %c0_49 = arith.constant 0 : index
    %118 = vector.load %arg10[%c0_48, %c0_49] : memref<16x32xf32, #tpu.memory_space<vmem>>, vector<16x32xf32>
    tpu.vector_store %arg10[%c0_48, %c0_49], %117 {strides = array<i32>} : memref<16x32xf32, #tpu.memory_space<vmem>>, vector<16x32xf32>,
    return
  }
}

</mosaic_0001>

<bundles_post_ra>
// kernel: tile.31
= control target key start
LH: loop header
LB: loop body
LE: loop exit
PB: predicated region body
PF: predicated region fallthrough
CT: control target
= control target key end

     0   :  { %vm82_vm0 = vcmask 1047556   ;;  %vm84_vm1 = vcmask 130048   ;;  %vm103_vm2 = vcmask 261248   ;;  %s225_s0 = inlined_call_operand.vmem [shape: f32[16,2,16], index: 0, kind: input, shape index: {}]   ;;  %s226_s1 = inlined_call_operand.vmem [shape: f32[16,32], index: 1, kind: output, shape index: {}]  }
   0x1   :  { %v138_v0 = vld [vmem:[%s225_s0 + $0xe] sm:$0x3]  ;;  %v139_v1 = vld [vmem:[%s225_s0 + $0xc] sm:$0x3]  ;;  %v140_v2 = vld [vmem:[%s225_s0 + $0xa] sm:$0x3] }
   0x2   :  { %48 = vst [vmem:[#allocation0 + $0x38] sm:$0x3] %v138_v0  ;;  %53 = vst [vmem:[#allocation0 + $0x30] sm:$0x3] %v139_v1  ;;  %v141_v3 = vld [vmem:[%s225_s0 + $0x8] sm:$0x3] }
   0x3   :  { %58 = vst [vmem:[#allocation0 + $0x28] sm:$0x3] %v140_v2  ;;  %v142_v4 = vld [vmem:[%s225_s0 + $0x6] sm:$0x3]  ;;  %v143_v5 = vld [vmem:[%s225_s0 + $0x4] sm:$0x3] }
   0x4   :  { %63 = vst [vmem:[#allocation0 + $0x20] sm:$0x3] %v141_v3  ;;  %68 = vst [vmem:[#allocation0 + $0x18] sm:$0x3] %v142_v4  ;;  %v144_v6 = vld [vmem:[%s225_s0 + $0x2] sm:$0x3] }
   0x5   :  { %73 = vst [vmem:[#allocation0 + $0x10] sm:$0x3] %v143_v5  ;;  %v78_v7 = vld [vmem:[%s225_s0] sm:$0x3]  ;;  %77 = vst [vmem:[#allocation0 + $0x8] sm:$0x3] %v144_v6 }
   0x6   :  { %79 = vst [vmem:[#allocation0] sm:$0x3] %v78_v7  ;;  %v130_v8 = vld [vmem:[%s225_s0 + $0x1e] sm:$0x3]  ;;  %v131_v9 = vld [vmem:[%s225_s0 + $0x1c] sm:$0x3] }
   0x7   :  { %v132_v10 = vld [vmem:[%s225_s0 + $0x1a] sm:$0x3]  ;;  %8 = vst [vmem:[#allocation0 + $0x78] sm:$0x3] %v130_v8  ;;  %13 = vst [vmem:[#allocation0 + $0x70] sm:$0x3] %v131_v9 }
   0x8   :  { %18 = vst [vmem:[#allocation0 + $0x68] sm:$0x3] %v132_v10  ;;  %v133_v11 = vld [vmem:[%s225_s0 + $0x18] sm:$0x3]  ;;  %v134_v12 = vld [vmem:[%s225_s0 + $0x16] sm:$0x3] }
   0x9   :  { %v135_v13 = vld [vmem:[%s225_s0 + $0x14] sm:$0x3]  ;;  %23 = vst [vmem:[#allocation0 + $0x60] sm:$0x3] %v133_v11  ;;  %28 = vst [vmem:[#allocation0 + $0x58] sm:$0x3] %v134_v12 }
   0xa   :  { %33 = vst [vmem:[#allocation0 + $0x50] sm:$0x3] %v135_v13  ;;  %v136_v14 = vld [vmem:[%s225_s0 + $0x12] sm:$0x3]  ;;  %v137_v15 = vld [vmem:[%s225_s0 + $0x10] sm:$0x3] }
   0xb   :  { %38 = vst [vmem:[#allocation0 + $0x48] sm:$0x3] %v136_v14  ;;  %43 = vst [vmem:[#allocation0 + $0x40] sm:$0x3] %v137_v15  ;;  %s148_s0 = smov 16  }
   0xc   :  { %v98_v16 = vld [vmem:[#allocation0 + $0x1] ss:$8 sm:$0xf0]   ;;  %v81_v17 = vld [vmem:[#allocation0] ss:$8 sm:$0xf0]  }
   0xd   :  { %v96_v18 = vld [vmem:[#allocation0 + $0x1] ss:$8 sm:$0xf]   ;;  %v80_v19 = vld [vmem:[#allocation0] ss:$8 sm:$0xf]  }
   0xe   :  { %v100_v20 = vsel %vm82_vm0, %v98_v16, %v96_v18  ;;  %v83_v21 = vsel %vm82_vm0, %v81_v17, %v80_v19 }
   0xf   :  { %101 = vrot.lane.b32.xlu0 %v100_v20, %s148_s0  ;;  %85 = vst.msk [vmem:[%s226_s1] sm:$0xff] %vm84_vm1, %v83_v21  }
  0x10   :  { %v108_v22 = vld [vmem:[#allocation0 + $0x41] ss:$8 sm:$0xf0]   ;;  %v89_v23 = vld [vmem:[#allocation0 + $0x40] ss:$8 sm:$0xf0]  }
  0x12   :  { %v106_v24 = vld [vmem:[#allocation0 + $0x41] ss:$8 sm:$0xf]   ;;  %v87_v25 = vld [vmem:[#allocation0 + $0x40] ss:$8 sm:$0xf]  }
  0x13   :  { %v110_v26 = vsel %vm82_vm0, %v108_v22, %v106_v24  ;;  %v91_v27 = vsel %vm82_vm0, %v89_v23, %v87_v25 }
  0x14   :  { %145 = vst.msk [vmem:[%s226_s1 + $0x8] sm:$0xff] %vm84_vm1, %v91_v27   ;;  %111 = vrot.lane.b32.xlu0 %v110_v26, %s148_s0 }
  0x81   :  { %v102_v28 = vpop.permute.xlu0 %101  }
  0x82   :  { %104 = vst.msk [vmem:[%s226_s1] sm:$0xff] %vm103_vm2, %v102_v28  }
  0x86   :  { %v112_v29 = vpop.permute.xlu0 %111  }
  0x87   :  { %146 = vst.msk [vmem:[%s226_s1 + $0x8] sm:$0xff] %vm103_vm2, %v112_v29  }

// kernel: tile.19
= control target key start
LH: loop header
LB: loop body
LE: loop exit
PB: predicated region body
PF: predicated region fallthrough
CT: control target
= control target key end

     0   :  { %vm82_vm0 = vcmask 1047556   ;;  %vm84_vm1 = vcmask 130048   ;;  %s195_s9 = smov 48   ;;  %s196_s14 = smov 16   ;;  %vm103_vm2 = vcmask 523648   ;;  %vm124_vm3 = vcmask 392448   ;;  %s289_s0 = inlined_call_operand.vmem [shape: f32[16,4,16], index: 0, kind: input, shape index: {}]   ;;  %s290_s1 = inlined_call_operand.vmem [shape: f32[16,64], index: 1, kind: output, shape index: {}]  }
   0x1   :  { %v180_v0 = vld [vmem:[%s289_s0 + $0x1c] sm:$0xf]  ;;  %v181_v1 = vld [vmem:[%s289_s0 + $0x18] sm:$0xf]  ;;  %v182_v2 = vld [vmem:[%s289_s0 + $0x14] sm:$0xf] }
   0x2   :  { %48 = vst [vmem:[#allocation0 + $0x38] sm:$0xf] %v180_v0  ;;  %53 = vst [vmem:[#allocation0 + $0x30] sm:$0xf] %v181_v1  ;;  %v183_v3 = vld [vmem:[%s289_s0 + $0x10] sm:$0xf] }
   0x3   :  { %58 = vst [vmem:[#allocation0 + $0x28] sm:$0xf] %v182_v2  ;;  %v184_v4 = vld [vmem:[%s289_s0 + $0xc] sm:$0xf]  ;;  %v185_v5 = vld [vmem:[%s289_s0 + $0x8] sm:$0xf] }
   0x4   :  { %63 = vst [vmem:[#allocation0 + $0x20] sm:$0xf] %v183_v3  ;;  %68 = vst [vmem:[#allocation0 + $0x18] sm:$0xf] %v184_v4  ;;  %v186_v6 = vld [vmem:[%s289_s0 + $0x4] sm:$0xf] }
   0x5   :  { %73 = vst [vmem:[#allocation0 + $0x10] sm:$0xf] %v185_v5  ;;  %v78_v7 = vld [vmem:[%s289_s0] sm:$0xf]  ;;  %77 = vst [vmem:[#allocation0 + $0x8] sm:$0xf] %v186_v6 }
   0x6   :  { %79 = vst [vmem:[#allocation0] sm:$0xf] %v78_v7  ;;  %v172_v8 = vld [vmem:[%s289_s0 + $0x3c] sm:$0xf]  ;;  %v173_v9 = vld [vmem:[%s289_s0 + $0x38] sm:$0xf] }
   0x7   :  { %8 = vst [vmem:[#allocation0 + $0x78] sm:$0xf] %v172_v8  ;;  %13 = vst [vmem:[#allocation0 + $0x70] sm:$0xf] %v173_v9  ;;  %v174_v10 = vld [vmem:[%s289_s0 + $0x34] sm:$0xf] }
   0x8   :  { %v175_v11 = vld [vmem:[%s289_s0 + $0x30] sm:$0xf]  ;;  %v176_v12 = vld [vmem:[%s289_s0 + $0x2c] sm:$0xf]  ;;  %18 = vst [vmem:[#allocation0 + $0x68] sm:$0xf] %v174_v10 }
   0x9   :  { %23 = vst [vmem:[#allocation0 + $0x60] sm:$0xf] %v175_v11  ;;  %28 = vst [vmem:[#allocation0 + $0x58] sm:$0xf] %v176_v12  ;;  %v177_v13 = vld [vmem:[%s289_s0 + $0x28] sm:$0xf] }
   0xa   :  { %v178_v14 = vld [vmem:[%s289_s0 + $0x24] sm:$0xf]  ;;  %v179_v15 = vld [vmem:[%s289_s0 + $0x20] sm:$0xf]  ;;  %33 = vst [vmem:[#allocation0 + $0x50] sm:$0xf] %v177_v13 }
   0xb   :  { %38 = vst [vmem:[#allocation0 + $0x48] sm:$0xf] %v178_v14  ;;  %43 = vst [vmem:[#allocation0 + $0x40] sm:$0xf] %v179_v15  ;;  %s194_s0 = smov 32   ;;  %vm145_vm4 = vcmask 261248  }
   0xc   :  { %v119_v16 = vld [vmem:[#allocation0 + $0x2] ss:$8 sm:$0xf0]   ;;  %v98_v17 = vld [vmem:[#allocation0 + $0x3] ss:$8 sm:$0xf0]  }
   0xd   :  { %v117_v18 = vld [vmem:[#allocation0 + $0x2] ss:$8 sm:$0xf]   ;;  %v96_v19 = vld [vmem:[#allocation0 + $0x3] ss:$8 sm:$0xf]  }
   0xe   :  { %v121_v20 = vsel %vm82_vm0, %v119_v16, %v117_v18  ;;  %v100_v21 = vsel %vm82_vm0, %v98_v17, %v96_v19  ;;  %v138_v24 = vld [vmem:[#allocation0 + $0x1] ss:$8 sm:$0xf]   ;;  %v80_v32 = vld [vmem:[#allocation0] ss:$8 sm:$0xf]  }
   0xf   :  { %122 = vrot.lane.b32.xlu1 %v121_v20, %s194_s0  ;;  %101 = vrot.lane.b32.xlu0 %v100_v21, %s195_s9  ;;  %v140_v25 = vld [vmem:[#allocation0 + $0x1] ss:$8 sm:$0xf0]   ;;  %v81_v33 = vld [vmem:[#allocation0] ss:$8 sm:$0xf0]  }
  0x10   :  { %v129_v22 = vld [vmem:[#allocation0 + $0x42] ss:$8 sm:$0xf0]   ;;  %v108_v23 = vld [vmem:[#allocation0 + $0x43] ss:$8 sm:$0xf0]   ;;  %v83_v34 = vsel %vm82_vm0, %v81_v33, %v80_v32  ;;  %v142_v38 = vsel %vm82_vm0, %v140_v25, %v138_v24 }
  0x11   :  { %v150_v31 = vld [vmem:[#allocation0 + $0x41] ss:$8 sm:$0xf0]   ;;  %v89_v36 = vld [vmem:[#allocation0 + $0x40] ss:$8 sm:$0xf0]  }
  0x12   :  { %v127_v26 = vld [vmem:[#allocation0 + $0x42] ss:$8 sm:$0xf]   ;;  %v106_v27 = vld [vmem:[#allocation0 + $0x43] ss:$8 sm:$0xf]  }
  0x13   :  { %v131_v28 = vsel %vm82_vm0, %v129_v22, %v127_v26  ;;  %v110_v29 = vsel %vm82_vm0, %v108_v23, %v106_v27  ;;  %v148_v30 = vld [vmem:[#allocation0 + $0x41] ss:$8 sm:$0xf]   ;;  %v87_v35 = vld [vmem:[#allocation0 + $0x40] ss:$8 sm:$0xf]  }
  0x14   :  { %132 = vrot.lane.b32.xlu1 %v131_v28, %s194_s0  ;;  %111 = vrot.lane.b32.xlu0 %v110_v29, %s195_s9  ;;  %v152_v37 = vsel %vm82_vm0, %v150_v31, %v148_v30  ;;  %85 = vst.msk [vmem:[%s290_s1] sm:$0xff] %vm84_vm1, %v83_v34   ;;  %v91_v39 = vsel %vm82_vm0, %v89_v36, %v87_v35 }
  0x15   :  { %187 = vst.msk [vmem:[%s290_s1 + $0x8] sm:$0xff] %vm84_vm1, %v91_v39  }
  0x18   :  { %153 = vrot.lane.b32.xlu1 %v152_v37, %s196_s14  ;;  %143 = vrot.lane.b32.xlu0 %v142_v38, %s196_s14 }
  0x81   :  { %v123_v40 = vpop.permute.xlu1 %122   ;;  %v102_v41 = vpop.permute.xlu0 %101  }
  0x82   :  { %104 = vst.msk [vmem:[%s290_s1] sm:$0xff] %vm103_vm2, %v102_v41  }
  0x83   :  { %125 = vst.msk [vmem:[%s290_s1] sm:$0xff] %vm124_vm3, %v123_v40  }
  0x86   :  { %v133_v42 = vpop.permute.xlu1 %132   ;;  %v112_v43 = vpop.permute.xlu0 %111  }
  0x87   :  { %188 = vst.msk [vmem:[%s290_s1 + $0x8] sm:$0xff] %vm103_vm2, %v112_v43  }
  0x88   :  { %189 = vst.msk [vmem:[%s290_s1 + $0x8] sm:$0xff] %vm124_vm3, %v133_v42  }
  0x8a   :  { %v154_v44 = vpop.permute.xlu1 %153   ;;  %v144_v45 = vpop.permute.xlu0 %143  }
  0x8b   :  { %190 = vst.msk [vmem:[%s290_s1 + $0x8] sm:$0xff] %vm145_vm4, %v154_v44   ;;  %146 = vst.msk [vmem:[%s290_s1] sm:$0xff] %vm145_vm4, %v144_v45  }

// kernel: gemma_decoder_layer.1
= control target key start
LH: loop header
LB: loop body
LE: loop exit
PB: predicated region body
PF: predicated region fallthrough
CT: control target
= control target key end

     0   :  { %vm42_vm0 = vcmask 261120   ;;  %s2045_s0 = inlined_call_operand.vmem [shape: f32[16,32], index: 0, kind: input, shape index: {}]   ;;  %s2046_s1 = inlined_call_operand.vmem [shape: f32[16,16], index: 1, kind: input, shape index: {}]   ;;  %s2047_s2 = inlined_call_operand.vmem [shape: f32[16,128], index: 2, kind: input, shape index: {}]   ;;  %s2048_s3 = inlined_call_operand.vmem [shape: f32[16,128], index: 3, kind: input, shape index: {}]   ;;  %s2049_s4 = inlined_call_operand.vmem [shape: f32[1,32], index: 4, kind: input, shape index: {}]   ;;  %s2050_s5 = inlined_call_operand.vmem [shape: f32[1,32], index: 5, kind: input, shape index: {}]   ;;  %s2051_s6 = inlined_call_operand.vmem [shape: f32[32,256], index: 6, kind: input, shape index: {}]   ;;  %s2052_s7 = inlined_call_operand.vmem [shape: f32[64,32], index: 7, kind: input, shape index: {}]   ;;  %s2053_s8 = inlined_call_operand.vmem [shape: f32[32,128], index: 8, kind: input, shape index: {}]   ;;  %s2054_s9 = inlined_call_operand.vmem [shape: f32[64,32], index: 9, kind: input, shape index: {}]   ;;  %s2055_s10 = inlined_call_operand.hbm [shape: f32[16,32], index: 10, kind: output, shape index: {}]  }
   0x1   :  { %v1762_v0 = vld [vmem:[%s2045_s0] sm:$0xff]  ;;  %v1767_v1 = vld [vmem:[%s2045_s0 + $0x8] sm:$0xff] }
   0x2   :  { %15 = vsyncpa [#allocation3], 0  ;;  %v40_v2 = vmul.f32 %v1762_v0, %v1762_v0  ;;  %v41_v3 = vmul.f32 %v1767_v1, %v1767_v1  ;;  %v68_v6 = vld [vmem:[%s2051_s6 + $0x8] sm:$0xff]  ;;  %v70_v7 = vld [vmem:[%s2051_s6 + $0x18] sm:$0xff]  ;;  %v1693_v13 = vmov 0.0   ;;  %vm174_vm1 = vcmask 130048  }
   0x3   :  { %v67_v8 = vld [vmem:[%s2051_s6] sm:$0xff]  ;;  %v1506_v9 = vpack.c.bf16 %v70_v7, %v68_v6  ;;  %v69_v10 = vld [vmem:[%s2051_s6 + $0x10] sm:$0xff]  ;;  %v72_v11 = vld [vmem:[%s2051_s6 + $0x28] sm:$0xff]  ;;  %145 = vmatprep.mubr.f32.mxu0 %v1693_v13  ;;  %s1694_s0 = smov 112   ;;  %s1696_s23 = smov 32   ;;  %vm967_vm3 = vcmask 392192  }
   0x4   :  { %v43_v4 = vsel %vm42_vm0, %v40_v2, 0.0  ;;  %v46_v5 = vsel %vm42_vm0, %v41_v3, 0.0  ;;  %v74_v12 = vld [vmem:[%s2051_s6 + $0x38] sm:$0xff]  ;;  %v1508_v14 = vpack.c.bf16 %v69_v10, %v67_v8  ;;  %v71_v16 = vld [vmem:[%s2051_s6 + $0x20] sm:$0xff]  ;;  %v73_v17 = vld [vmem:[%s2051_s6 + $0x30] sm:$0xff]  ;;  %s1697_s24 = smov 48  }
   0x5   :  { %44 = vadd.xlane.f32.xlu0 %v43_v4  ;;  %v1510_v15 = vpack.c.bf16 %v74_v12, %v72_v11  ;;  %1507 = vmatprep.subr.bf16.mxu0 %v1506_v9  ;;  %v1512_v18 = vpack.c.bf16 %v73_v17, %v71_v16  ;;  %v1309_v26 = vld [vmem:[%s2049_s4] ss:$0 sm:$0xff]  ;;  %v159_v38 = vld [vmem:[%s2047_s2 + $0x8] sm:$0xff]  ;;  %vm1834_vm2 = vmpackc.low %vm174_vm1, %vm174_vm1  ;;  %s1699_s25 = smov 16   ;;  %s1700_s26 = smov 80   ;;  %vm978_vm4 = vcmask 523264  }
   0x6   :  { %1509 = vmatpush1.bf16.msra.mxu0 %v1508_v14  ;;  %v158_v32 = vld [vmem:[%s2047_s2] sm:$0xff]  ;;  %v163_v39 = vld [vmem:[%s2048_s3 + $0x8] sm:$0xff]  ;;  %s1695_s2 = smov 64  }
   0x7   :  { %1511 = vmatprep.subr.bf16.mxu0 %v1510_v15  ;;  %v162_v33 = vld [vmem:[%s2048_s3] sm:$0xff]  ;;  %v1853_v54 = vld [vmem:[%s2046_s1 + $0x8] sm:$0xff] }
   0x8   :  { %v1858_v56 = vld [vmem:[%s2046_s1] sm:$0xff]  ;;  %s1698_s1 = smov 96  }
   0x9   :  { %47 = vadd.xlane.f32.xlu0 %v46_v5 }
   0xa   :  { %1513 = vmatpush1.bf16.msra.mxu0 %v1512_v18 }
  0x92   :  { %v45_v19 = vpop.xlane.xlu0 %44 }
  0x93   :  { %v50_v20 = vmul.f32 0.03125, %v45_v19 }
  0x95   :  { %v52_v21 = vadd.f32 1e-06, %v50_v20 }
  0x96   :  { %v48_v22 = vpop.xlane.xlu0 %47 }
  0x97   :  { %1625 = vrsqrt.f32 %v52_v21  ;;  %v51_v23 = vmul.f32 0.03125, %v48_v22 }
  0x99   :  { %v53_v24 = vadd.f32 1e-06, %v51_v23 }
  0x9b   :  { %1627 = vrsqrt.f32 %v53_v24 }
  0xa1   :  { %v1626_v25 = vpop.eup %1625 }
  0xa2   :  { %v56_v27 = vmul.f32 %v1626_v25, %v1762_v0 }
  0xa4   :  { %v65_v28 = vmul.f32 %v1309_v26, %v56_v27 }
  0xa5   :  { %v1628_v29 = vpop.eup %1627 }
  0xa6   :  { %1310 = vmatmul.mubr.msk.f32.vlgmr.msra.gmra.mrb[0].mxu0 %vm42_vm0, %v65_v28  ;;  %v57_v30 = vmul.f32 %v1628_v29, %v1767_v1 }
  0xa7   :  { %151 = vmatprep.mubr.f32.mxu0 %v1693_v13 }
  0xa8   :  { %v66_v31 = vmul.f32 %v1309_v26, %v57_v30 }
  0xaa   :  { %1311 = vmatmul.mubr.msk.f32.gmra.mrb[2].mxu0 %vm42_vm0, %v66_v31 }
 0x179   :  { %v147_v34 = vpop.f32.mrb[0].mxu0 }
 0x17a   :  { %v160_v35 = vmul.f32 %v158_v32, %v147_v34  ;;  %v149_v36 = vpop.f32.mrb[1].mxu0 }
 0x17b   :  { %v164_v37 = vmul.f32 %v162_v33, %v149_v36 }
 0x17d   :  { %v1818_v40 = vadd.f32 %v164_v37, %v160_v35  ;;  %v153_v41 = vpop.f32.mrb[2].mxu0 }
 0x17e   :  { %v161_v42 = vmul.f32 %v159_v38, %v153_v41  ;;  %v155_v43 = vpop.f32.mrb[3].mxu0 }
 0x17f   :  { %v165_v44 = vmul.f32 %v163_v39, %v155_v43  ;;  %1405 = vmatprep.mubr.msk.f32.mxu1 %vm174_vm1, %v1818_v40 }
 0x181   :  { %v1822_v45 = vadd.f32 %v165_v44, %v161_v42 }
 0x183   :  { %369 = vrot.lane.b32.xlu0 %v1822_v45, %s1694_s0  ;;  %v1827_v46 = vpack.i.bf16 %v1822_v45, %v1818_v40 }
 0x185   :  { %1606 = vrot.lane.b32.xlu1 %v1827_v46, %s1695_s2 }
 0x189   :  { %367 = vrot.lane.b32.xlu1 %v1818_v40, %s1694_s0 }
 0x1f5   :  { %v370_v53 = vpop.permute.xlu0 %369 }
 0x1f7   :  { %v1607_v47 = vpop.permute.xlu1 %1606 }
 0x1f8   :  { %v1609_v48 = vunpack.i.h.bf16 %v1607_v47  ;;  %v1608_v49 = vunpack.i.l.bf16 %v1607_v47 }
 0x1fa   :  { %v1514_v51 = vpack.c.bf16 %v1609_v48, %v1608_v49 }
 0x1fb   :  { %v368_v52 = vpop.permute.xlu1 %367 }
 0x1fc   :  { %1516 = vmatprep.subr.msk.bf16.mxu1 %vm1834_vm2, %v1514_v51  ;;  %1526 = vmatprep.subr.msk.bf16.mxu0 %vm1834_vm2, %v1514_v51 }
 0x1fd   :  { %1419 = vmatprep.mubr.msk.f32.mxu0 %vm174_vm1, %v368_v52  ;;  %1519 = vmatpush3.bf16.xpose.msk.msra.mxu1 %vm1834_vm2, %v1514_v51 }
 0x1fe   :  { %1529 = vmatpush3.bf16.xpose.msk.msra.mxu0 %vm1834_vm2, %v1514_v51 }
 0x204   :  { %1406 = vmatmul.mubr.msk.f32.vlgmr.msra.gmra.mrb[0].mxu1 %vm174_vm1, %v1822_v45 }
 0x205   :  { %1420 = vmatmul.mubr.msk.f32.vlgmr.msra.gmra.mrb[4].mxu0 %vm174_vm1, %v370_v53 }
 0x2d7   :  { %v1407_v55 = vpop.f32.mrb[0].mxu1 }
 0x2d8   :  { %v1421_v57 = vpop.f32.mrb[4].mxu0  ;;  %v249_v58 = vpop.f32.mrb[1].mxu1  ;;  %v255_v2 = vadd.f32 %v1407_v55, %v1853_v54 }
 0x2d9   :  { %v447_v59 = vadd.f32 %v1421_v57, %v1853_v54  ;;  %v441_v60 = vpop.f32.mrb[5].mxu0  ;;  %v250_v22 = vadd.f32 %v249_v58, %v1858_v56 }
 0x2da   :  { %v442_v61 = vadd.f32 %v441_v60, %v1858_v56  ;;  %v261_v3 = vsel %vm174_vm1, %v255_v2, -inf }
 0x2db   :  { %v453_v62 = vsel %vm174_vm1, %v447_v59, -inf  ;;  %v258_v23 = vsel %vm174_vm1, %v250_v22, -inf }
 0x2dc   :  { %454 = vmax.xlane.f32.xlu0 %v453_v62  ;;  %v450_v63 = vsel %vm174_vm1, %v442_v61, -inf }
 0x2dd   :  { %451 = vmax.xlane.f32.xlu1 %v450_v63 }
 0x2ee   :  { %1611 = vrot.lane.b32.xlu1 %v1827_v46, %s1696_s23 }
 0x2f2   :  { %1616 = vrot.lane.b32.xlu0 %v1827_v46, %s1697_s24  ;;  %553 = vrot.lane.b32.xlu1 %v1818_v40, %s1698_s1 }
 0x311   :  { %262 = vmax.xlane.f32.xlu0 %v261_v3 }
 0x369   :  { %v455_v4 = vpop.xlane.xlu0 %454 }
 0x36a   :  { %v457_v5 = vsub.f32 %v447_v59, %v455_v4  ;;  %v452_v6 = vpop.xlane.xlu1 %451 }
 0x36b   :  { %v456_v7 = vsub.f32 %v442_v61, %v452_v6 }
 0x36c   :  { %v460_v8 = vmul.f32 1.442695, %v457_v5 }
 0x36d   :  { %v458_v9 = vmul.f32 1.442695, %v456_v7  ;;  %v1617_v10 = vpop.permute.xlu0 %1616 }
 0x36e   :  { %1629 = vpow2.f32 %v460_v8  ;;  %v1612_v11 = vpop.permute.xlu1 %1611  ;;  %v1619_v12 = vunpack.i.h.bf16 %v1617_v10  ;;  %v1618_v13 = vunpack.i.l.bf16 %v1617_v10 }
 0x36f   :  { %v1614_v14 = vunpack.i.h.bf16 %v1612_v11  ;;  %v1613_v15 = vunpack.i.l.bf16 %v1612_v11  ;;  %1631 = vpow2.f32 %v458_v9 }
 0x370   :  { %v1872_v17 = vpack.c.bf16 %v1619_v12, %v1618_v13 }
 0x371   :  { %v1520_v16 = vpack.c.bf16 %v1614_v14, %v1613_v15 }
 0x372   :  { %v554_v24 = vpop.permute.xlu1 %553 }
 0x373   :  { %1521 = vmatprep.subr.bf16.mxu1 %v1520_v16  ;;  %1531 = vmatprep.subr.bf16.mxu0 %v1520_v16 }
 0x374   :  { %1523 = vmatpush3.bf16.msra.mxu1 %v1520_v16  ;;  %1533 = vmatpush3.bf16.msra.mxu0 %v1520_v16 }
 0x375   :  { %1536 = vmatprep.subr.msk.bf16.mxu0 %vm1834_vm2, %v1872_v17 }
 0x378   :  { %v1630_v18 = vpop.eup %1629 }
 0x379   :  { %v465_v19 = vsel %vm174_vm1, %v1630_v18, 0.0  ;;  %v1632_v20 = vpop.eup %1631 }
 0x37a   :  { %466 = vadd.xlane.f32.xlu1 %v465_v19  ;;  %v462_v21 = vsel %vm174_vm1, %v1632_v20, 0.0 }
 0x37e   :  { %463 = vadd.xlane.f32.xlu1 %v462_v21 }
 0x38f   :  { %555 = vrot.lane.b32.xlu1 %v1822_v45, %s1698_s1 }
 0x39e   :  { %v263_v32 = vpop.xlane.xlu0 %262 }
 0x39f   :  { %v265_v34 = vsub.f32 %v255_v2, %v263_v32 }
 0x3a1   :  { %v268_v36 = vmul.f32 1.442695, %v265_v34 }
 0x3b3   :  { %259 = vmax.xlane.f32.xlu1 %v258_v23 }
 0x407   :  { %v467_v25 = vpop.xlane.xlu1 %466 }
 0x408   :  { %1633 = vrcp.f32 %v467_v25 }
 0x40b   :  { %v464_v26 = vpop.xlane.xlu1 %463 }
 0x40c   :  { %1635 = vrcp.f32 %v464_v26 }
 0x40d   :  { %1637 = vpow2.f32 %v268_v36 }
 0x40f   :  { %v556_v31 = vpop.permute.xlu1 %555 }
 0x412   :  { %v1634_v27 = vpop.eup %1633 }
 0x413   :  { %v471_v30 = vmul.f32 %v1634_v27, %v1630_v18 }
 0x416   :  { %v1636_v28 = vpop.eup %1635 }
 0x417   :  { %v469_v29 = vmul.f32 %v1636_v28, %v1632_v20  ;;  %v1638_v48 = vpop.eup %1637 }
 0x418   :  { %v273_v52 = vsel %vm174_vm1, %v1638_v48, 0.0 }
 0x419   :  { %1426 = vmatprep.mubr.msk.f32.mxu0 %vm174_vm1, %v469_v29 }
 0x41a   :  { %1427 = vmatmul.mubr.msk.f32.vlgmr.msra.gmra.mrb[6].mxu0 %vm174_vm1, %v471_v30 }
 0x41b   :  { %1539 = vmatpush3.bf16.xpose.msk.msra.mxu0 %vm1834_vm2, %v1872_v17  ;;  %1433 = vmatprep.mubr.msk.f32.mxu0 %vm174_vm1, %v554_v24 }
 0x422   :  { %1434 = vmatmul.mubr.msk.f32.vlgmr.msra.gmra.mrb[8].mxu0 %vm174_vm1, %v556_v31 }
 0x440   :  { %v260_v33 = vpop.xlane.xlu1 %259 }
 0x441   :  { %v264_v35 = vsub.f32 %v250_v22, %v260_v33 }
 0x443   :  { %v266_v37 = vmul.f32 1.442695, %v264_v35 }
 0x445   :  { %1639 = vpow2.f32 %v266_v37 }
 0x44f   :  { %v1640_v51 = vpop.eup %1639 }
 0x450   :  { %v270_v53 = vsel %vm174_vm1, %v1640_v51, 0.0 }
 0x4ed   :  { %v1890_v38 = vpop.f32.mrb[6].mxu0 }
 0x4ee   :  { %v1892_v39 = vpop.f32.mrb[7].mxu0 }
 0x4f5   :  { %v1435_v41 = vpop.f32.mrb[8].mxu0 }
 0x4f6   :  { %v641_v42 = vadd.f32 %v1435_v41, %v1853_v54  ;;  %v635_v43 = vpop.f32.mrb[9].mxu0 }
 0x4f7   :  { %v636_v44 = vadd.f32 %v635_v43, %v1858_v56 }
 0x4f8   :  { %v647_v47 = vsel %vm174_vm1, %v641_v42, -inf }
 0x4f9   :  { %648 = vmax.xlane.f32.xlu0 %v647_v47  ;;  %v644_v49 = vsel %vm174_vm1, %v636_v44, -inf  ;;  %v972_v47 = vld [vmem:[%s2052_s7 + $0x10] sm:$0xff] }
 0x4fa   :  { %645 = vmax.xlane.f32.xlu1 %v644_v49  ;;  %v973_v49 = vld [vmem:[%s2052_s7 + $0x18] sm:$0xff] }
 0x4fd   :  { %274 = vadd.xlane.f32.xlu0 %v273_v52  ;;  %v974_v52 = vld [vmem:[%s2052_s7 + $0x20] sm:$0xff] }
 0x4fe   :  { %271 = vadd.xlane.f32.xlu1 %v270_v53  ;;  %v975_v53 = vld [vmem:[%s2052_s7 + $0x28] sm:$0xff] }
 0x50f   :  { %1621 = vrot.lane.b32.xlu1 %v1827_v46, %s1699_s25 }
 0x586   :  { %v649_v55 = vpop.xlane.xlu0 %648 }
 0x587   :  { %v651_v57 = vsub.f32 %v641_v42, %v649_v55  ;;  %v646_v58 = vpop.xlane.xlu1 %645  ;;  %v1562_v55 = vpack.c.bf16 %v975_v53, %v974_v52 }
 0x588   :  { %v650_v59 = vsub.f32 %v636_v44, %v646_v58  ;;  %v977_v58 = vld [vmem:[%s2052_s7 + $0x38] sm:$0xff] }
 0x589   :  { %v654_v60 = vmul.f32 1.442695, %v651_v57  ;;  %v976_v57 = vld [vmem:[%s2052_s7 + $0x30] sm:$0xff] }
 0x58a   :  { %v652_v61 = vmul.f32 1.442695, %v650_v59  ;;  %v275_v62 = vpop.xlane.xlu0 %274  ;;  %v1566_v59 = vpack.c.bf16 %v977_v58, %v976_v57 }
 0x58b   :  { %1641 = vpow2.f32 %v654_v60  ;;  %v272_v63 = vpop.xlane.xlu1 %271 }
 0x58c   :  { %1643 = vpow2.f32 %v652_v61 }
 0x58d   :  { %1645 = vrcp.f32 %v275_v62 }
 0x58e   :  { %1647 = vrcp.f32 %v272_v63 }
 0x58f   :  { %v1622_v2 = vpop.permute.xlu1 %1621 }
 0x590   :  { %v1624_v3 = vunpack.i.h.bf16 %v1622_v2  ;;  %v1623_v4 = vunpack.i.l.bf16 %v1622_v2 }
 0x592   :  { %v1540_v5 = vpack.c.bf16 %v1624_v3, %v1623_v4 }
 0x594   :  { %1541 = vmatprep.subr.bf16.mxu1 %v1540_v5  ;;  %1551 = vmatprep.subr.bf16.mxu0 %v1540_v5 }
 0x595   :  { %v1642_v6 = vpop.eup %1641  ;;  %1553 = vmatpush3.bf16.msra.mxu0 %v1540_v5 }
 0x596   :  { %v1644_v46 = vpop.eup %1643  ;;  %v659_v7 = vsel %vm174_vm1, %v1642_v6, 0.0 }
 0x597   :  { %v1646_v8 = vpop.eup %1645  ;;  %660 = vadd.xlane.f32.xlu0 %v659_v7  ;;  %v656_v9 = vsel %vm174_vm1, %v1644_v46, 0.0 }
 0x598   :  { %v1648_v10 = vpop.eup %1647  ;;  %657 = vadd.xlane.f32.xlu1 %v656_v9  ;;  %v279_v12 = vmul.f32 %v1646_v8, %v1638_v48 }
 0x599   :  { %v277_v11 = vmul.f32 %v1648_v10, %v1640_v51  ;;  %v1558_v51 = vpack.c.bf16 %v973_v49, %v972_v47 }
 0x59b   :  { %1412 = vmatprep.mubr.msk.f32.mxu1 %vm174_vm1, %v277_v11 }
 0x59c   :  { %1413 = vmatmul.mubr.msk.f32.vlgmr.msra.gmra.mrb[2].mxu1 %vm174_vm1, %v279_v12 }
 0x59d   :  { %1543 = vmatpush3.bf16.msra.mxu1 %v1540_v5 }
 0x59e   :  { %1546 = vmatprep.subr.msk.bf16.mxu1 %vm1834_vm2, %v1872_v17 }
 0x5a9   :  { %755 = vrot.lane.b32.xlu1 %v1822_v45, %s1700_s26 }
 0x5ad   :  { %753 = vrot.lane.b32.xlu0 %v1818_v40, %s1700_s26 }
 0x624   :  { %v661_v13 = vpop.xlane.xlu0 %660 }
 0x625   :  { %1649 = vrcp.f32 %v661_v13  ;;  %v658_v14 = vpop.xlane.xlu1 %657 }
 0x626   :  { %1651 = vrcp.f32 %v658_v14 }
 0x628   :  { %v754_v20 = vpop.permute.xlu0 %753 }
 0x629   :  { %v756_v40 = vpop.permute.xlu1 %755 }
 0x62f   :  { %v1650_v15 = vpop.eup %1649 }
 0x630   :  { %v1652_v16 = vpop.eup %1651  ;;  %v665_v19 = vmul.f32 %v1650_v15, %v1642_v6 }
 0x631   :  { %v663_v18 = vmul.f32 %v1652_v16, %v1644_v46 }
 0x633   :  { %1440 = vmatprep.mubr.msk.f32.mxu1 %vm174_vm1, %v663_v18 }
 0x634   :  { %1441 = vmatmul.mubr.msk.f32.vlgmr.msra.gmra.mrb[4].mxu1 %vm174_vm1, %v665_v19 }
 0x635   :  { %1549 = vmatpush3.bf16.xpose.msk.msra.mxu1 %vm1834_vm2, %v1872_v17  ;;  %1447 = vmatprep.mubr.msk.f32.mxu1 %vm174_vm1, %v754_v20  ;;  %v1089_v20 = vld [vmem:[%s2053_s8 + $0x10] sm:$0xff] }
 0x63c   :  { %1448 = vmatmul.mubr.msk.f32.vlgmr.msra.gmra.mrb[6].mxu1 %vm174_vm1, %v756_v40 }
 0x66f   :  { %v1918_v45 = vpop.f32.mrb[2].mxu1 }
 0x670   :  { %v1920_v21 = vpop.f32.mrb[3].mxu1 }
 0x707   :  { %v1442_v22 = vpop.f32.mrb[4].mxu1 }
 0x708   :  { %v744_v23 = vpop.f32.mrb[5].mxu1 }
 0x70f   :  { %v1449_v24 = vpop.f32.mrb[6].mxu1 }
 0x710   :  { %v833_v25 = vadd.f32 %v1449_v24, %v1853_v54  ;;  %v827_v26 = vpop.f32.mrb[7].mxu1 }
 0x711   :  { %v828_v27 = vadd.f32 %v827_v26, %v1858_v56 }
 0x712   :  { %v839_v50 = vsel %vm174_vm1, %v833_v25, -inf }
 0x713   :  { %840 = vmax.xlane.f32.xlu0 %v839_v50  ;;  %v836_v17 = vsel %vm174_vm1, %v828_v27, -inf }
 0x714   :  { %837 = vmax.xlane.f32.xlu1 %v836_v17 }
 0x7a0   :  { %v841_v28 = vpop.xlane.xlu0 %840 }
 0x7a1   :  { %v843_v29 = vsub.f32 %v833_v25, %v841_v28  ;;  %v838_v30 = vpop.xlane.xlu1 %837 }
 0x7a2   :  { %v842_v31 = vsub.f32 %v828_v27, %v838_v30 }
 0x7a3   :  { %v846_v32 = vmul.f32 1.442695, %v843_v29  ;;  %v1338_v29 = vld [vmem:[%s2050_s5] ss:$0 sm:$0xff] }
 0x7a4   :  { %v844_v33 = vmul.f32 1.442695, %v842_v31 }
 0x7a5   :  { %1653 = vpow2.f32 %v846_v32 }
 0x7a6   :  { %1655 = vpow2.f32 %v844_v33  ;;  %v1200_v33 = vld [vmem:[%s2054_s9] sm:$0xff] }
 0x7af   :  { %v1654_v34 = vpop.eup %1653 }
 0x7b0   :  { %v1656_v35 = vpop.eup %1655  ;;  %v851_v54 = vsel %vm174_vm1, %v1654_v34, 0.0 }
 0x7b1   :  { %852 = vadd.xlane.f32.xlu1 %v851_v54  ;;  %v848_v56 = vsel %vm174_vm1, %v1656_v35, 0.0 }
 0x7b2   :  { %849 = vadd.xlane.f32.xlu0 %v848_v56  ;;  %v1203_v56 = vld [vmem:[%s2054_s9 + $0x18] sm:$0xff] }
 0x7c2   :  { %943 = vrot.lane.b32.xlu1 %v1890_v38, %s1699_s25  ;;  %v970_v38 = vld [vmem:[%s2052_s7] sm:$0xff] }
 0x7c6   :  { %949 = vrot.lane.b32.xlu1 %v744_v23, %s1696_s23 }
 0x7c8   :  { %941 = vrot.lane.b32.xlu0 %v1892_v39, %s1699_s25  ;;  %v971_v39 = vld [vmem:[%s2052_s7 + $0x8] sm:$0xff] }
 0x7c9   :  { %v1554_v48 = vpack.c.bf16 %v971_v39, %v970_v38 }
 0x7cb   :  { %1555 = vmatprep.subr.bf16.mxu0 %v1554_v48 }
 0x7cc   :  { %951 = vrot.lane.b32.xlu0 %v1442_v22, %s1696_s23 }
 0x83e   :  { %v853_v36 = vpop.xlane.xlu1 %852 }
 0x83f   :  { %1657 = vrcp.f32 %v853_v36  ;;  %v850_v37 = vpop.xlane.xlu0 %849 }
 0x840   :  { %1659 = vrcp.f32 %v850_v37  ;;  %v1204_v37 = vld [vmem:[%s2054_s9 + $0x20] sm:$0xff] }
 0x842   :  { %v944_v63 = vpop.permute.xlu1 %943 }
 0x843   :  { %v942_v62 = vpop.permute.xlu0 %941  ;;  %v964_v6 = vsel %vm174_vm1, %v1918_v45, %v944_v63  ;;  %v1090_v45 = vld [vmem:[%s2053_s8 + $0x18] sm:$0xff] }
 0x844   :  { %v963_v4 = vsel %vm174_vm1, %v1920_v21, %v942_v62  ;;  %v1574_v21 = vpack.c.bf16 %v1090_v45, %v1089_v20 }
 0x846   :  { %v950_v3 = vpop.permute.xlu1 %949 }
 0x847   :  { %v952_v2 = vpop.permute.xlu0 %951  ;;  %v965_v46 = vsel %vm42_vm0, %v963_v4, %v950_v3 }
 0x848   :  { %v966_v8 = vsel %vm42_vm0, %v964_v6, %v952_v2 }
 0x849   :  { %v1658_v41 = vpop.eup %1657 }
 0x84a   :  { %v1660_v42 = vpop.eup %1659  ;;  %v857_v44 = vmul.f32 %v1658_v41, %v1654_v34  ;;  %v1201_v34 = vld [vmem:[%s2054_s9 + $0x8] sm:$0xff] }
 0x84b   :  { %v855_v43 = vmul.f32 %v1660_v42, %v1656_v35  ;;  %v1202_v35 = vld [vmem:[%s2054_s9 + $0x10] sm:$0xff]  ;;  %v1578_v54 = vpack.c.bf16 %v1201_v34, %v1200_v33  ;;  %v1205_v41 = vld [vmem:[%s2054_s9 + $0x28] sm:$0xff] }
 0x84c   :  { %v1582_v36 = vpack.c.bf16 %v1203_v56, %v1202_v35  ;;  %v1586_v42 = vpack.c.bf16 %v1205_v41, %v1204_v37 }
 0x84d   :  { %1454 = vmatprep.mubr.msk.f32.mxu0 %vm174_vm1, %v855_v43  ;;  %v1206_v43 = vld [vmem:[%s2054_s9 + $0x30] sm:$0xff] }
 0x84e   :  { %1455 = vmatmul.mubr.msk.f32.vlgmr.msra.gmra.mrb[10].mxu0 %vm174_vm1, %v857_v44  ;;  %v1207_v44 = vld [vmem:[%s2054_s9 + $0x38] sm:$0xff]  ;;  %s1701_s9 = smov [#allocation2]  }
 0x84f   :  { %1557 = vmatpush3.bf16.msra.mxu0 %v1554_v48  ;;  %v1590_v38 = vpack.c.bf16 %v1207_v44, %v1206_v43 }
 0x850   :  { %1559 = vmatprep.subr.bf16.mxu0 %v1558_v51 }
 0x853   :  { %1561 = vmatpush3.bf16.msra.mxu0 %v1558_v51 }
 0x854   :  { %1563 = vmatprep.subr.bf16.mxu0 %v1562_v55 }
 0x857   :  { %1565 = vmatpush3.bf16.msra.mxu0 %v1562_v55 }
 0x858   :  { %1567 = vmatprep.subr.bf16.mxu0 %v1566_v59 }
 0x85b   :  { %1569 = vmatpush3.bf16.msra.mxu0 %v1566_v59 }
 0x921   :  { %v1456_v60 = vpop.f32.mrb[10].mxu0 }
 0x922   :  { %959 = vrot.lane.b32.xlu0 %v1456_v60, %s1697_s24  ;;  %v930_v61 = vpop.f32.mrb[11].mxu0 }
 0x923   :  { %957 = vrot.lane.b32.xlu1 %v930_v61, %s1697_s24 }
 0x994   :  { %v960_v5 = vpop.permute.xlu0 %959 }
 0x995   :  { %v958_v7 = vpop.permute.xlu1 %957  ;;  %v969_v10 = vsel %vm967_vm3, %v966_v8, %v960_v5 }
 0x996   :  { %v968_v9 = vsel %vm967_vm3, %v965_v46, %v958_v7 }
 0x997   :  { %1473 = vmatprep.mubr.msk.f32.mxu0 %vm978_vm4, %v968_v9 }
 0x998   :  { %1474 = vmatmul.mubr.msk.f32.vlgmr.msra.gmra.mrb[12].mxu0 %vm978_vm4, %v969_v10 }
 0xa6b   :  { %v1475_v11 = vpop.f32.mrb[12].mxu0 }
 0xa6c   :  { %v1971_v12 = vadd.f32 %v1475_v11, %v1767_v1  ;;  %v1051_v13 = vpop.f32.mrb[13].mxu0  ;;  %v1087_v1 = vld [vmem:[%s2053_s8] sm:$0xff] }
 0xa6d   :  { %v1974_v14 = vadd.f32 %v1051_v13, %v1762_v0  ;;  %v1088_v0 = vld [vmem:[%s2053_s8 + $0x8] sm:$0xff] }
 0xa6e   :  { %v1063_v15 = vmul.f32 %v1971_v12, %v1971_v12  ;;  %v1570_v40 = vpack.c.bf16 %v1088_v0, %v1087_v1 }
 0xa6f   :  { %v1062_v16 = vmul.f32 %v1974_v14, %v1974_v14 }
 0xa70   :  { %v1067_v18 = vsel %vm42_vm0, %v1063_v15, 0.0  ;;  %1571 = vmatprep.subr.bf16.mxu1 %v1570_v40 }
 0xa71   :  { %1068 = vadd.xlane.f32.xlu0 %v1067_v18  ;;  %v1064_v19 = vsel %vm42_vm0, %v1062_v16, 0.0  ;;  %1573 = vmatpush3.bf16.msra.mxu1 %v1570_v40 }
 0xa72   :  { %1065 = vadd.xlane.f32.xlu1 %v1064_v19  ;;  %1575 = vmatprep.subr.bf16.mxu1 %v1574_v21 }
 0xa75   :  { %1577 = vmatpush3.bf16.msra.mxu1 %v1574_v21 }
 0xa76   :  { %1579 = vmatprep.subr.bf16.mxu1 %v1578_v54 }
 0xafe   :  { %v1069_v22 = vpop.xlane.xlu0 %1068 }
 0xaff   :  { %v1071_v23 = vmul.f32 0.03125, %v1069_v22  ;;  %v1066_v24 = vpop.xlane.xlu1 %1065 }
 0xb00   :  { %v1070_v25 = vmul.f32 0.03125, %v1066_v24 }
 0xb01   :  { %v1073_v26 = vadd.f32 1e-06, %v1071_v23 }
 0xb02   :  { %v1072_v27 = vadd.f32 1e-06, %v1070_v25 }
 0xb03   :  { %1661 = vrsqrt.f32 %v1073_v26 }
 0xb04   :  { %1663 = vrsqrt.f32 %v1072_v27 }
 0xb0d   :  { %v1662_v50 = vpop.eup %1661 }
 0xb0e   :  { %v1664_v17 = vpop.eup %1663  ;;  %v1077_v28 = vmul.f32 %v1662_v50, %v1971_v12 }
 0xb0f   :  { %v1076_v30 = vmul.f32 %v1664_v17, %v1974_v14 }
 0xb10   :  { %v1086_v32 = vmul.f32 %v1338_v29, %v1077_v28 }
 0xb11   :  { %v1085_v31 = vmul.f32 %v1338_v29, %v1076_v30 }
 0xb13   :  { %1484 = vmatprep.mubr.msk.f32.mxu1 %vm42_vm0, %v1085_v31 }
 0xb14   :  { %1485 = vmatmul.mubr.msk.f32.vlgmr.msra.gmra.mrb[8].mxu1 %vm42_vm0, %v1086_v32 }
 0xb15   :  { %1581 = vmatpush3.bf16.msra.mxu1 %v1578_v54 }
 0xb16   :  { %1583 = vmatprep.subr.bf16.mxu1 %v1582_v36 }
 0xb19   :  { %1585 = vmatpush3.bf16.msra.mxu1 %v1582_v36 }
 0xb1a   :  { %1587 = vmatprep.subr.bf16.mxu1 %v1586_v42 }
 0xb1d   :  { %1589 = vmatpush3.bf16.msra.mxu1 %v1586_v42 }
 0xb1e   :  { %1591 = vmatprep.subr.bf16.mxu1 %v1590_v38 }
 0xb21   :  { %1593 = vmatpush3.bf16.msra.mxu1 %v1590_v38 }
 0xbe7   :  { %v1486_v39 = vpop.f32.mrb[8].mxu1 }
 0xbe8   :  { %1194 = vrot.lane.b32.xlu1 %v1486_v39, %s1695_s2  ;;  %v1163_v47 = vpop.f32.mrb[9].mxu1  ;;  %v1175_v49 = vmul.f32 0.044715, %v1486_v39  ;;  %v1173_v4 = vmul.f32 0.5, %v1486_v39 }
 0xbe9   :  { %1192 = vrot.lane.b32.xlu0 %v1163_v47, %s1695_s2  ;;  %v1174_v48 = vmul.f32 0.044715, %v1163_v47  ;;  %v1172_v3 = vmul.f32 0.5, %v1163_v47  ;;  %s1298_s2 = sshll.u32 %s1701_s9, 4  ;;  %s1299_s2 = int_to_ptr.vmem [resolvable:$true] %s1298_s2 }
 0xbea   :  { %v1177_v52 = vmul.f32 %v1486_v39, %v1175_v49  ;;  %s1669_s19 = scalar_lea.vmem %s1299_s2, 256  ;;  %p1674_p1 = scmp.lt.s32.totalorder %s1299_s2, %s1299_s2 }
 0xbeb   :  { %v1176_v51 = vmul.f32 %v1174_v48, %v1163_v47  ;;  %p1670_p0 = scmp.ne.s32.totalorder %s1299_s2, %s1669_s19  ;;  %p1675_p2 = scmp.lt.s32.totalorder %s1669_s19, %s1669_s19 }
 0xbec   :  { %v1179_v55 = vmul.f32 %v1486_v39, %v1177_v52 }
 0xbed   :  { %v1178_v53 = vmul.f32 %v1176_v51, %v1163_v47  ;;  %p1676_p3 = por %p1675_p2, %p1674_p1 }
 0xbee   :  { %v1181_v58 = vadd.f32 %v1486_v39, %v1179_v55 }
 0xbef   :  { %v1180_v57 = vadd.f32 %v1178_v53, %v1163_v47  ;;  %p1677_p4 = pnand %p1676_p3, %p1670_p0 }
 0xbf0   :  { %v1183_v60 = vmul.f32 0.7978846, %v1181_v58 }
 0xbf1   :  { %v1182_v59 = vmul.f32 0.7978846, %v1180_v57 }
 0xbf3   :  { %1665 = vtanh.f32 %v1182_v59 }
 0xbf4   :  { %1667 = vtanh.f32 %v1183_v60 }
 0xbfd   :  { %v1666_v61 = vpop.eup %1665 }
 0xbfe   :  { %v1668_v62 = vpop.eup %1667  ;;  %v1186_v63 = vadd.f32 1.0, %v1666_v61 }
 0xbff   :  { %v1187_v2 = vadd.f32 1.0, %v1668_v62 }
 0xc00   :  { %v1188_v6 = vmul.f32 %v1186_v63, %v1172_v3 }
 0xc01   :  { %v1189_v46 = vmul.f32 %v1187_v2, %v1173_v4 }
 0xc5a   :  { %v1195_v5 = vpop.permute.xlu1 %1194 }
 0xc5b   :  { %v1193_v7 = vpop.permute.xlu0 %1192  ;;  %v1199_v9 = vmul.f32 %v1195_v5, %v1189_v46 }
 0xc5c   :  { %v1198_v8 = vmul.f32 %v1193_v7, %v1188_v6 }
 0xc5e   :  { %1503 = vmatprep.mubr.msk.f32.mxu1 %vm978_vm4, %v1198_v8 }
 0xc5f   :  { %1504 = vmatmul.mubr.msk.f32.vlgmr.msra.gmra.mrb[10].mxu1 %vm978_vm4, %v1199_v9 }
 0xd32   :  { %v1505_v10 = vpop.f32.mrb[10].mxu1 }
 0xd33   :  { %v1290_v11 = vadd.f32 %v1505_v10, %v1971_v12  ;;  %v1280_v13 = vpop.f32.mrb[11].mxu1 }
 0xd34   :  { %v1289_v15 = vadd.f32 %v1280_v13, %v1974_v14 }
 0xd35   :  { %1292 = vst.msk [vmem:[#allocation2 + $0x8] sm:$0xff] %vm42_vm0, %v1290_v11 }
 0xd36   :  { %1291 = vst.msk [vmem:[#allocation2] sm:$0xff] %vm42_vm0, %v1289_v15 }
 0xd37   :  { %1680 = shalt.err (!%p1677_p4)
}
 0xd38   :  { %s1681_s3 = scalar_lea.hbm %s2055_s10, 256 }
 0xd39   :  { %p1682_p5 = scmp.ne.s32.totalorder %s2055_s10, %s1681_s3  ;;  %p1685_p6 = scmp.lt.u32.totalorder %s1681_s3, %s2055_s10 }
 0xd3b   :  { %p1687_p7 = pnand %p1685_p6, %p1682_p5 }
 0xd3d   :  { %1690 = shalt.err (!%p1687_p7)
}
 0xd3e   :  { %s1702_s24 = smov 128   ;;  %s1703_s1 = smov 8  }
 0xd3f   :  { %1304 = dma.vmem_to_hbm [thread:$0]  %s1299_s2, 256, %s2055_s10, [#allocation3], %s1702_s24, %s1702_s24, %s1703_s1  }
 0xd40   :  { %1691 = dma.done.wait [#allocation3], 256  }
 0xd41   :  { %1692 = vsyncadd [#allocation3], 4294967040 }
 0xd42   :  { %1308 = vsyncpa [#allocation3], 1 }

</bundles_post_ra>
